<compile_context>
chip_gen: v5e
topology: v5e:2x2
jax: 0.10.0
libtpu: 0.0.40
codegen_flags: <defaults>
</compile_context>

<pallas_src>
from functools import lru_cache

import jax
import jax.numpy as jnp
from jax.experimental import pallas as pl
from jax.experimental.pallas import tpu as pltpu

LANE = 128
SUBLANE = 8


def _round_up(x, m):
    return ((x + m - 1) // m) * m


# --------------------------- hardware-aware budgets ---------------------------

@lru_cache(maxsize=1)
def _tpu_info():
    try:
        return pltpu.get_tpu_info()
    except Exception:
        return None


def _vmem_budget():
    """(data_budget_bytes, vmem_limit_bytes) derived from the chip's VMEM."""
    cap = 64 * 1024 * 1024  # conservative fallback = v7x per-core VMEM
    info = _tpu_info()
    if info is not None:
        cap = int(getattr(info, "vmem_capacity_bytes", cap) or cap)
    return int(cap * 0.60), int(cap * 0.75)


def _num_tensorcores():
    info = _tpu_info()
    if info is not None:
        for name in ("num_cores", "tensorcores_per_chip", "num_tensorcores",
                     "core_count"):
            v = getattr(info, name, None)
            if v:
                return int(v)
    return 1  # safe default: single-TC behaviour (no forced batch split)


# ------------------------------ kernels --------------------------------------

def _linear_kernel(x_ref, wt_ref, b_ref, o_ref):
    """Single-K path: whole reduction dim resident. One MXU matmul + bias add."""
    x = x_ref[...]
    if x.dtype != wt_ref.dtype:          # e.g. bf16 weights: feed the MXU in bf16
        x = x.astype(wt_ref.dtype)
    acc = jnp.dot(x, wt_ref[...], preferred_element_type=jnp.float32)
    o_ref[...] = (acc + b_ref[...]).astype(o_ref.dtype)


def _linear_kernel_ksplit(x_ref, wt_ref, b_ref, o_ref, acc_ref):
    """K-split path: f32 accumulator seeded with the bias; epilogue = cast+store."""
    k = pl.program_id(1)

    @pl.when(k == 0)
    def _():
        acc_ref[...] = jnp.broadcast_to(b_ref[...], acc_ref.shape)

    x = x_ref[...]
    if x.dtype != wt_ref.dtype:
        x = x.astype(wt_ref.dtype)
    acc_ref[...] += jnp.dot(x, wt_ref[...], preferred_element_type=jnp.float32)

    @pl.when(k == pl.num_programs(1) - 1)
    def _():
        o_ref[...] = acc_ref[...].astype(o_ref.dtype)


# ------------------------------ tiling logic ----------------------------------

def _fits_single(tile_b, D, Cp, w_isz, x_isz, out_isz, budget):
    # W^T and bias are grid-invariant -> single-buffered (Buffered(1));
    # x / out tiles are double-buffered by the pipeline.
    nbytes = (D * Cp * w_isz                 # resident W^T
              + Cp * 4                       # bias (f32)
              + 2 * tile_b * D * x_isz       # x tile
              + 2 * tile_b * Cp * out_isz)   # out tile
    return nbytes <= budget


def _batch_tile(B, cores):
    """Batch tile: multiple of 8, up to 512 rows.  Split across TensorCores only
    when it buys real parallelism (multi-TC chip AND a large batch)."""
    if B <= SUBLANE:
        return B
    tb = min(512, _round_up(B, SUBLANE))
    if cores >= 2 and B >= 512:
        # >= 2 grid steps per core so both cores get work and DMA still overlaps.
        tb = min(tb, max(SUBLANE, _round_up(pl.cdiv(B, 2 * cores), SUBLANE)))
    return tb


def _choose_ksplit_tiles(B, Dp, Cp, w_isz, x_isz, out_isz, budget, cores):
    def fits(tb, tk):
        nbytes = (2 * tb * tk * x_isz        # x tile (double-buffered)
                  + 2 * tk * Cp * w_isz      # W^T tile (varies with k)
                  + Cp * 4                   # bias (f32, Buffered(1))
                  + 2 * tb * Cp * out_isz    # out tile
                  + tb * Cp * 4)             # f32 accumulator scratch
        return nbytes <= budget

    tb = _batch_tile(B, cores)
    while True:
        for tk in (4096, 2048, 1024, 512, 256, 128):
            if tk <= Dp and Dp % tk == 0 and fits(tb, tk):
                return tb, tk
        if tb <= SUBLANE:
            return SUBLANE, 128              # Dp is a multiple of 128 by construction
        tb = max(SUBLANE, ((tb // 2) // SUBLANE) * SUBLANE)


# ------------------------------ wrapper ---------------------------------------

def prepare_linear_probe_params(weight, bias, *, param_dtype=None):
    """One-time packing of nn.Linear params.

    weight: (C, D) PyTorch layout, bias: (C,).
    If the resident-W^T (single-K) path fits VMEM, returns wt_p of shape (D, Cp)
    (only the class dim lane-padded) so the hot path needs NO padding of x.
    Otherwise returns a fully padded (Dp, Cp) W^T for the K-split path.
    Optionally stores weights in bf16 (param_dtype=jnp.bfloat16) for 2x MXU
    throughput with f32 accumulation; bias stays f32.
    """
    C, D = weight.shape
    Cp = _round_up(C, LANE)
    w_dtype = jnp.dtype(param_dtype) if param_dtype is not None else jnp.dtype(weight.dtype)
    data_budget, _ = _vmem_budget()

    if _fits_single(SUBLANE, D, Cp, w_dtype.itemsize, 4, 4, data_budget):
        wt_p = jnp.zeros((D, Cp), w_dtype).at[:, :C].set(weight.T.astype(w_dtype))
    else:
        Dp = _round_up(D, LANE)
        wt_p = jnp.zeros((Dp, Cp), w_dtype).at[:D, :C].set(weight.T.astype(w_dtype))

    b_p = jnp.zeros((1, Cp), jnp.float32).at[0, :C].set(bias.astype(jnp.float32))
    return wt_p, b_p


def linear_probe_apply(x, wt_p, b_p, num_classes, *, return_padded=False):
    """Hot path.  x: (B, D) -> (B, num_classes) (or (B, Cp) if return_padded)."""
    B, D = x.shape
    Dw, Cp = wt_p.shape
    assert Dw >= D and num_classes <= Cp

    x_isz = jnp.dtype(x.dtype).itemsize
    w_isz = jnp.dtype(wt_p.dtype).itemsize
    out_isz = x_isz
    data_budget, vmem_limit = _vmem_budget()
    cores = _num_tensorcores()

    cost = pl.CostEstimate(
        flops=2 * B * Dw * Cp,
        transcendentals=0,
        bytes_accessed=B * D * x_isz + Dw * Cp * w_isz + Cp * 4 + B * Cp * out_isz,
    )

    if Dw == D:
        # Resident-W^T single-K path.  Full-extent contraction dim -> no x pad.
        tile_b = _batch_tile(B, cores)
        while tile_b > SUBLANE and not _fits_single(
                tile_b, D, Cp, w_isz, x_isz, out_isz, data_budget):
            tile_b = max(SUBLANE, ((tile_b // 2) // SUBLANE) * SUBLANE)

        out = pl.pallas_call(
            _linear_kernel,
            out_shape=jax.ShapeDtypeStruct((B, Cp), x.dtype),
            grid_spec=pltpu.PrefetchScalarGridSpec(
                num_scalar_prefetch=0,
                grid=(pl.cdiv(B, tile_b),),
                in_specs=[
                    pl.BlockSpec((tile_b, D), lambda i: (i, 0)),          # x tile
                    pl.BlockSpec((D, Cp), lambda i: (0, 0),
                                 pipeline_mode=pl.Buffered(1)),           # W^T, resident
                    pl.BlockSpec((1, Cp), lambda i: (0, 0),
                                 pipeline_mode=pl.Buffered(1)),           # bias, resident
                ],
                out_specs=pl.BlockSpec((tile_b, Cp), lambda i: (i, 0)),
            ),
            compiler_params=pltpu.CompilerParams(
                dimension_semantics=("parallel",),
                vmem_limit_bytes=vmem_limit,
            ),
            cost_estimate=cost,
        )(x, wt_p, b_p)
    else:
        # Large input_dim: K-split with an f32 accumulator.  Contraction dim is
        # padded once to the prepared (128-aligned) Dw.
        if D != Dw:
            x = jnp.pad(x, ((0, 0), (0, Dw - D)))
        tile_b, tile_k = _choose_ksplit_tiles(
            B, Dw, Cp, w_isz, x_isz, out_isz, data_budget, cores)

        out = pl.pallas_call(
            _linear_kernel_ksplit,
            out_shape=jax.ShapeDtypeStruct((B, Cp), x.dtype),
            grid_spec=pltpu.PrefetchScalarGridSpec(
                num_scalar_prefetch=0,
                grid=(pl.cdiv(B, tile_b), Dw // tile_k),
                in_specs=[
                    pl.BlockSpec((tile_b, tile_k), lambda i, k: (i, k)),
                    pl.BlockSpec((tile_k, Cp), lambda i, k: (k, 0)),
                    pl.BlockSpec((1, Cp), lambda i, k: (0, 0),
                                 pipeline_mode=pl.Buffered(1)),           # bias, resident
                ],
                out_specs=pl.BlockSpec((tile_b, Cp), lambda i, k: (i, 0)),
                scratch_shapes=[pltpu.VMEM((tile_b, Cp), jnp.float32)],
            ),
            compiler_params=pltpu.CompilerParams(
                dimension_semantics=("parallel", "arbitrary"),
                vmem_limit_bytes=vmem_limit,
            ),
            cost_estimate=cost,
        )(x, wt_p, b_p)

    if return_padded:
        # Consumers that can mask (argmax/softmax over :num_classes) avoid the
        # extra HBM slice pass and keep lane-dense stores end-to-end.
        return out
    return out[:, :num_classes]


def linear_probe(x, weight, bias, *, param_dtype=None):
    """Convenience one-shot entry point (prep + apply).  Prefer calling
    prepare_linear_probe_params once and linear_probe_apply per step."""
    wt_p, b_p = prepare_linear_probe_params(weight, bias, param_dtype=param_dtype)
    return linear_probe_apply(x, wt_p, b_p, weight.shape[0])


if __name__ == "__main__":
    key = jax.random.PRNGKey(0)
    kx, kw, kb, kx2, kw2, kb2 = jax.random.split(key, 6)

    # Case 1: canonical probe shapes (lane-aligned input_dim).
    input_dim, num_classes, batch = 128, 8, 16
    x = jax.random.normal(kx, (batch, input_dim), dtype=jnp.float32)
    # nn.Linear layout: weight (num_classes, input_dim), bias (num_classes,)
    weight = jax.random.normal(kw, (num_classes, input_dim), dtype=jnp.float32) * 0.02
    bias = jax.random.normal(kb, (num_classes,), dtype=jnp.float32) * 0.02

    wt_p, b_p = prepare_linear_probe_params(weight, bias)
    out = jax.block_until_ready(linear_probe_apply(x, wt_p, b_p, num_classes))
    ref = x @ weight.T + bias
    assert out.shape == (batch, num_classes)
    assert jnp.allclose(out, ref, atol=1e-4, rtol=1e-4)

    # Case 2: non-multiple-of-8 batch and non-multiple-of-128 input_dim
    # (exercises the pad-free full-extent contraction path + partial batch tile).
    input_dim2, num_classes2, batch2 = 100, 5, 13
    x2 = jax.random.normal(kx2, (batch2, input_dim2), dtype=jnp.float32)
    weight2 = jax.random.normal(kw2, (num_classes2, input_dim2), dtype=jnp.float32) * 0.02
    bias2 = jax.random.normal(kb2, (num_classes2,), dtype=jnp.float32) * 0.02
    out2 = jax.block_until_ready(linear_probe(x2, weight2, bias2))
    ref2 = x2 @ weight2.T + bias2
    assert out2.shape == (batch2, num_classes2)
    assert jnp.allclose(out2, ref2, atol=1e-4, rtol=1e-4)

    print("KERNEL_OK")
</pallas_src>

<mosaic_0001>
module attributes {stable_mosaic.version = 11 : i64} {
  func.func @_linear_kernel(%arg0: i32, %arg1: memref<16x128xf32, #tpu.memory_space<vmem>>, %arg2: memref<128x128xf32, #tpu.memory_space<vmem>>, %arg3: memref<1x128xf32, #tpu.memory_space<vmem>>, %arg4: memref<16x128xf32, #tpu.memory_space<vmem>>) attributes {dimension_semantics = [#tpu.dimension_semantics<parallel>], iteration_bounds = array<i64: 1>, scalar_prefetch = 0 : i64, scratch_operands = 0 : i64, tpu.core_type = #tpu.core_type<tc>, window_params = [{transform_indices = @transform_0, window_bounds = array<i64: 16, 128>}, {pipeline_mode = #tpu.pipeline_mode<synchronous>, transform_indices = @transform_1, window_bounds = array<i64: 128, 128>}, {pipeline_mode = #tpu.pipeline_mode<synchronous>, transform_indices = @transform_2, window_bounds = array<i64: 1, 128>}, {transform_indices = @transform_3, window_bounds = array<i64: 16, 128>}]} {
    %c0 = arith.constant 0 : index
    %c0_0 = arith.constant 0 : index
    %0 = vector.load %arg1[%c0, %c0_0] : memref<16x128xf32, #tpu.memory_space<vmem>>, vector<16x128xf32>
    %c0_1 = arith.constant 0 : index
    %c0_2 = arith.constant 0 : index
    %1 = vector.load %arg2[%c0_1, %c0_2] : memref<128x128xf32, #tpu.memory_space<vmem>>, vector<128x128xf32>
    %cst = arith.constant dense<0.000000e+00> : vector<16x128xf32>
    %2 = tpu.matmul %0, %1, %cst {dimension_numbers = #tpu.dot_dimension_numbers<[1], [0], [0], [1], [0, 0, 1, 1], [], []>} : vector<16x128xf32>, vector<128x128xf32>, vector<16x128xf32> -> vector<16x128xf32>
    %c0_3 = arith.constant 0 : index
    %c0_4 = arith.constant 0 : index
    %3 = vector.load %arg3[%c0_3, %c0_4] : memref<1x128xf32, #tpu.memory_space<vmem>>, vector<1x128xf32>
    %4 = vector.broadcast %3 : vector<1x128xf32> to vector<16x128xf32>
    %5 = arith.addf %2, %4 : vector<16x128xf32>
    %c0_5 = arith.constant 0 : index
    %c0_6 = arith.constant 0 : index
    %6 = vector.load %arg4[%c0_5, %c0_6] : memref<16x128xf32, #tpu.memory_space<vmem>>, vector<16x128xf32>
    tpu.vector_store %arg4[%c0_5, %c0_6], %5 {strides = array<i32>} : memref<16x128xf32, #tpu.memory_space<vmem>>, vector<16x128xf32>,
    return
  }
  func.func @transform_0(%arg0: i32) -> (i32, i32) {
    %c0_i32 = arith.constant 0 : i32
    %c0_i32_0 = arith.constant 0 : i32
    return %arg0, %c0_i32 : i32, i32
  }
  func.func @transform_1(%arg0: i32) -> (i32, i32) {
    %c0_i32 = arith.constant 0 : i32
    %c0_i32_0 = arith.constant 0 : i32
    %c0_i32_1 = arith.constant 0 : i32
    return %c0_i32, %c0_i32_0 : i32, i32
  }
  func.func @transform_2(%arg0: i32) -> (i32, i32) {
    %c0_i32 = arith.constant 0 : i32
    %c0_i32_0 = arith.constant 0 : i32
    %c0_i32_1 = arith.constant 0 : i32
    return %c0_i32, %c0_i32_0 : i32, i32
  }
  func.func @transform_3(%arg0: i32) -> (i32, i32) {
    %c0_i32 = arith.constant 0 : i32
    %c0_i32_0 = arith.constant 0 : i32
    return %arg0, %c0_i32 : i32, i32
  }
}

</mosaic_0001>

<bundles_post_ra>
// kernel: tpu_custom_call.1
= control target key start
LH: loop header
LB: loop body
LE: loop exit
PB: predicated region body
PF: predicated region fallthrough
CT: control target
= control target key end

     0   :  { %8 = vsyncpa [#allocation3], 0  ;;  %s260_s0 = inlined_call_operand.hbm [shape: f32[16,128], index: 0, kind: input, shape index: {}]   ;;  %s261_s1 = inlined_call_operand.hbm [shape: f32[128,128], index: 1, kind: input, shape index: {}]   ;;  %s262_s2 = inlined_call_operand.vmem [shape: f32[1,128], index: 2, kind: input, shape index: {}]   ;;  %s263_s3 = inlined_call_operand.hbm [shape: f32[16,128], index: 3, kind: output, shape index: {}]  }
   0x1   :  { %9 = vsyncpa [#allocation6], 0 }
   0x2   :  { %10 = vsyncpa [#allocation4], 0  ;;  %s15_s14 = sshll.u32 %s260_s0, 4  ;;  %s214_s15 = smov [#allocation2]   ;;  %s16_s14 = int_to_ptr.hbm [resolvable:$true] %s15_s14 }
   0x3   :  { %s17_s16 = sshll.u32 %s214_s15, 4  ;;  %s28_s19 = sshll.u32 %s261_s1, 4  ;;  %s18_s16 = int_to_ptr.vmem [resolvable:$true] %s17_s16  ;;  %s29_s19 = int_to_ptr.hbm [resolvable:$true] %s28_s19 }
   0x4   :  { %s215_s20 = smov 128   ;;  %s216_s21 = smov 8  }
   0x5   :  { %23 = dma.hbm_to_vmem [thread:$0]  %s16_s14, 256, %s18_s16, [#allocation3], %s215_s20, %s215_s20, %s216_s21  }
   0x6   :  { %s217_s22 = smov [#allocation5]  }
   0x7   :  { %s30_s23 = sshll.u32 %s217_s22, 4  ;;  %s31_s23 = int_to_ptr.vmem [resolvable:$true] %s30_s23 }
   0x8   :  { %36 = dma.hbm_to_vmem [thread:$0]  %s29_s19, 2048, %s31_s23, [#allocation6], %s215_s20, %s215_s20, %s216_s21  }
   0x9   :  { %208 = dma.done.wait [#allocation3], 256  }
   0xa   :  { %209 = vsyncadd [#allocation3], 4294967040 }
   0xb   :  { %210 = dma.done.wait [#allocation6], 2048  }
   0xc   :  { %211 = vsyncadd [#allocation6], 4294965248  ;;  %v64_v0 = vld [vmem:[#allocation5 + $0x78] sm:$0xff]  ;;  %v63_v1 = vld [vmem:[#allocation5 + $0x70] sm:$0xff]  ;;  %s218_s24 = smov [#allocation7]   ;;  %s100_s28 = sshll.u32 %s263_s3, 4  ;;  %s101_s28 = int_to_ptr.hbm [resolvable:$true] %s100_s28 }
   0xd   :  { %69 = vmatpush.msra.mxu0 %v64_v0  ;;  %114 = vmatpush.msra.mxu1 %v64_v0  ;;  %v62_v2 = vld [vmem:[#allocation5 + $0x68] sm:$0xff]  ;;  %v61_v3 = vld [vmem:[#allocation5 + $0x60] sm:$0xff]  ;;  %v60_v4 = vld [vmem:[#allocation5 + $0x58] sm:$0xff]  ;;  %s98_s25 = sshll.u32 %s218_s24, 4  ;;  %s99_s25 = int_to_ptr.vmem [resolvable:$true] %s98_s25 }
   0xe   :  { %v59_v5 = vld [vmem:[#allocation5 + $0x50] sm:$0xff]  ;;  %v58_v6 = vld [vmem:[#allocation5 + $0x48] sm:$0xff]  ;;  %v57_v7 = vld [vmem:[#allocation5 + $0x40] sm:$0xff] }
   0xf   :  { %70 = vmatpush.msra.mxu0 %v63_v1  ;;  %115 = vmatpush.msra.mxu1 %v63_v1  ;;  %v56_v8 = vld [vmem:[#allocation5 + $0x38] sm:$0xff]  ;;  %v55_v9 = vld [vmem:[#allocation5 + $0x30] sm:$0xff]  ;;  %v54_v10 = vld [vmem:[#allocation5 + $0x28] sm:$0xff] }
  0x10   :  { %v53_v11 = vld [vmem:[#allocation5 + $0x20] sm:$0xff]  ;;  %v52_v12 = vld [vmem:[#allocation5 + $0x18] sm:$0xff]  ;;  %v51_v13 = vld [vmem:[#allocation5 + $0x10] sm:$0xff] }
  0x11   :  { %71 = vmatpush.msra.mxu0 %v62_v2  ;;  %116 = vmatpush.msra.mxu1 %v62_v2  ;;  %v50_v14 = vld [vmem:[#allocation5 + $0x8] sm:$0xff]  ;;  %v49_v15 = vld [vmem:[#allocation5] sm:$0xff]  ;;  %v47_v16 = vld [vmem:[#allocation2] sm:$0xff] }
  0x12   :  { %v48_v17 = vld [vmem:[#allocation2 + $0x8] sm:$0xff]  ;;  %v135_v18 = vld [vmem:[%s262_s2] ss:$0 sm:$0xff] }
  0x13   :  { %72 = vmatpush.msra.mxu0 %v61_v3  ;;  %117 = vmatpush.msra.mxu1 %v61_v3 }
  0x15   :  { %73 = vmatpush.msra.mxu0 %v60_v4  ;;  %118 = vmatpush.msra.mxu1 %v60_v4 }
  0x17   :  { %74 = vmatpush.msra.mxu0 %v59_v5  ;;  %119 = vmatpush.msra.mxu1 %v59_v5 }
  0x19   :  { %75 = vmatpush.msra.mxu0 %v58_v6  ;;  %120 = vmatpush.msra.mxu1 %v58_v6 }
  0x1b   :  { %76 = vmatpush.msra.mxu0 %v57_v7  ;;  %121 = vmatpush.msra.mxu1 %v57_v7 }
  0x1d   :  { %77 = vmatpush.msra.mxu0 %v56_v8  ;;  %122 = vmatpush.msra.mxu1 %v56_v8 }
  0x1f   :  { %78 = vmatpush.msra.mxu0 %v55_v9  ;;  %123 = vmatpush.msra.mxu1 %v55_v9 }
  0x21   :  { %79 = vmatpush.msra.mxu0 %v54_v10  ;;  %124 = vmatpush.msra.mxu1 %v54_v10 }
  0x23   :  { %80 = vmatpush.msra.mxu0 %v53_v11  ;;  %125 = vmatpush.msra.mxu1 %v53_v11 }
  0x25   :  { %81 = vmatpush.msra.mxu0 %v52_v12  ;;  %126 = vmatpush.msra.mxu1 %v52_v12 }
  0x27   :  { %82 = vmatpush.msra.mxu0 %v51_v13  ;;  %127 = vmatpush.msra.mxu1 %v51_v13 }
  0x29   :  { %83 = vmatpush.msra.mxu0 %v50_v14  ;;  %128 = vmatpush.msra.mxu1 %v50_v14 }
  0x2b   :  { %84 = vmatpush.msra.mxu0 %v49_v15  ;;  %129 = vmatpush.msra.mxu1 %v49_v15 }
  0x2c   :  { %85 = vmatmul.f32.vlgmr.msra.gmra.mxu0 %v47_v16  ;;  %88 = vmatmul.f32.vlgmr.msra.gmra.mxu1 %v48_v17 }
  0xa9   :  { %v86_v19 = vpop.f32.mrf.mxu0  ;;  %v89_v20 = vpop.f32.mrf.mxu1 }
  0xaa   :  { %v87_v21 = vadd.f32 %v135_v18, %v86_v19  ;;  %v90_v22 = vadd.f32 %v135_v18, %v89_v20 }
  0xac   :  { %92 = vst [vmem:[#allocation7] sm:$0xff] %v87_v21 }
  0xad   :  { %93 = vst [vmem:[#allocation7 + $0x8] sm:$0xff] %v90_v22 }
  0xae   :  { %106 = dma.vmem_to_hbm [thread:$0]  %s99_s25, 256, %s101_s28, [#allocation4], %s215_s20, %s215_s20, %s216_s21  }
  0xaf   :  { %212 = dma.done.wait [#allocation4], 256  }
  0xb0   :  { %213 = vsyncadd [#allocation4], 4294967040 }
  0xb1   :  { %111 = vsyncpa [#allocation3], 1 }
  0xb2   :  { %112 = vsyncpa [#allocation6], 1 }
  0xb3   :  { %113 = vsyncpa [#allocation4], 1 }

</bundles_post_ra>
